<compile_context>
chip_gen: v5e
topology: v5e:2x2
jax: 0.10.0
libtpu: 0.0.40
codegen_flags: <defaults>
</compile_context>

<pallas_src>
import functools

import numpy as np

import jax
import jax.numpy as jnp
from jax.experimental import pallas as pl
from jax.experimental.pallas import tpu as pltpu

_TARGET_BLOCK_BYTES = 2 * 1024 * 1024   # ~2 MiB x-block: amortizes ~0.35us/step,
                                        # 4x (double-buffered in+out) fits v5e's 16 MiB scoped VMEM
_LANE = 128
_SUBLANE = 8
_MIN_SPLIT_BYTES = 512 * 1024           # only split a single-block launch if it's worth a 2nd step


def _drop_path_kernel(scale_ref, x_ref, o_ref):
    # scale_ref: (TILE_B, 1) f32 per-sample factor (0, 1, or 1/keep_prob).
    # x_ref / o_ref: (TILE_B, TILE_N) in the input dtype.
    # Multiply stays in the input dtype; scale broadcasts across lanes.
    o_ref[...] = x_ref[...] * scale_ref[...].astype(x_ref.dtype)


def _block_shape(B, N, itemsize):
    """Pick (TILE_B, TILE_N) honoring the (8,128)-or-full-dim block rule and a
    ~_TARGET_BLOCK_BYTES per-block budget."""
    row_bytes = max(N * itemsize, 1)
    if B <= _SUBLANE:
        tile_b = B                                     # == full dim -> always legal
    else:
        want_b = max(1, _TARGET_BLOCK_BYTES // row_bytes)
        tile_b = max(_SUBLANE,
                     min((want_b // _SUBLANE) * _SUBLANE,
                         (B // _SUBLANE) * _SUBLANE))  # multiple of 8, <= B

    max_n = max(_LANE, _TARGET_BLOCK_BYTES // (tile_b * itemsize))
    if N <= max_n:
        tile_n = N                                     # == full dim -> always legal
    else:
        tile_n = (max_n // _LANE) * _LANE              # lane-dense multiple of 128

    # If everything fits in one block but the tensor is reasonably large, split
    # the feature axis so a v7x megacore gets two balanced parallel steps.
    if (tile_b >= B and tile_n >= N
            and B * row_bytes >= _MIN_SPLIT_BYTES and N >= 2 * _LANE):
        half = -(-N // 2)
        tile_n = -(-half // _LANE) * _LANE
    return tile_b, tile_n


@functools.partial(jax.jit, static_argnames=("drop_prob", "scale_by_keep", "training"))
def drop_path(x, rng_key, drop_prob=0.0, scale_by_keep=True, training=True):
    """DropPath forward. x: (B, ...) any trailing dims (NCHW in this module)."""
    if drop_prob == 0.0 or not training:
        return x

    keep_prob = 1.0 - float(drop_prob)
    B = x.shape[0]
    N = int(np.prod(x.shape[1:])) if x.ndim > 1 else 1

    # Per-sample Bernoulli(keep_prob), optionally rescaled by 1/keep_prob.
    # TODO(synk): pltpu.prng_seed/prng_random_bits could draw the mask on-chip,
    # but a single (B,) draw in the (jitted) wrapper is negligible and keeps the
    # mask identical across every feature block of a sample.
    keep = jax.random.bernoulli(rng_key, p=keep_prob, shape=(B,)).astype(jnp.float32)
    scale = keep / keep_prob if (scale_by_keep and keep_prob > 0.0) else keep
    scale = scale.reshape(B, 1)

    x2 = x.reshape(B, N)                 # collapses contiguous trailing dims; free
    itemsize = x2.dtype.itemsize
    tile_b, tile_n = _block_shape(B, N, itemsize)
    grid = (-(-B // tile_b), -(-N // tile_n))   # ragged final blocks are masked

    out2 = pl.pallas_call(
        _drop_path_kernel,
        out_shape=jax.ShapeDtypeStruct((B, N), x.dtype),
        grid=grid,
        in_specs=[
            pl.BlockSpec((tile_b, 1), lambda b, n: (b, 0)),        # per-sample scale
            pl.BlockSpec((tile_b, tile_n), lambda b, n: (b, n)),   # x
        ],
        out_specs=pl.BlockSpec((tile_b, tile_n), lambda b, n: (b, n)),
        compiler_params=pltpu.CompilerParams(
            dimension_semantics=("parallel", "parallel")),
        cost_estimate=pl.CostEstimate(
            flops=B * N,
            transcendentals=0,
            bytes_accessed=2 * B * N * itemsize + B * 4),
    )(scale, x2)

    return out2.reshape(x.shape)


if __name__ == "__main__":
    key = jax.random.PRNGKey(0)
    # Small NCHW input consistent with the module's usage inside SAM2 blocks.
    x = jax.random.normal(key, (2, 4, 16, 16), dtype=jnp.float32)

    drop_prob = 0.25
    keep_prob = 1.0 - drop_prob
    y = drop_path(x, jax.random.PRNGKey(1234), drop_prob=drop_prob,
                  scale_by_keep=True, training=True)
    y = jax.block_until_ready(y)

    x_np = np.asarray(x)
    y_np = np.asarray(y)
    for b in range(x_np.shape[0]):
        kept = np.allclose(y_np[b], x_np[b] / keep_prob, rtol=1e-5, atol=1e-5)
        dropped = np.allclose(y_np[b], 0.0)
        assert kept or dropped, f"sample {b}: output is not a pure keep/drop of input"

    # Ragged feature count (N=315) + bf16: exercises the masked final-block path.
    xb = jax.random.normal(jax.random.PRNGKey(2), (3, 5, 7, 9), dtype=jnp.bfloat16)
    yb = jax.block_until_ready(
        drop_path(xb, jax.random.PRNGKey(7), drop_prob=0.5, training=True))
    xb_np = np.asarray(xb, dtype=np.float32)
    yb_np = np.asarray(yb, dtype=np.float32)
    for b in range(xb_np.shape[0]):
        kept = np.allclose(yb_np[b], xb_np[b] / 0.5, rtol=2e-2, atol=2e-2)
        dropped = np.allclose(yb_np[b], 0.0)
        assert kept or dropped, f"bf16 sample {b}: output is not a pure keep/drop"

    # Eval mode / drop_prob == 0 is the identity path.
    y_eval = drop_path(x, jax.random.PRNGKey(0), drop_prob=drop_prob, training=False)
    assert np.allclose(np.asarray(y_eval), x_np)

    print("KERNEL_OK")
</pallas_src>

<mosaic_0001>
module attributes {stable_mosaic.version = 11 : i64} {
  func.func @_drop_path_kernel(%arg0: i32, %arg1: i32, %arg2: memref<2x1xf32, #tpu.memory_space<vmem>>, %arg3: memref<2x1024xf32, #tpu.memory_space<vmem>>, %arg4: memref<2x1024xf32, #tpu.memory_space<vmem>>) attributes {dimension_semantics = [#tpu.dimension_semantics<parallel>, #tpu.dimension_semantics<parallel>], iteration_bounds = array<i64: 1, 1>, scalar_prefetch = 0 : i64, scratch_operands = 0 : i64, tpu.core_type = #tpu.core_type<tc>, window_params = [{transform_indices = @transform_0, window_bounds = array<i64: 2, 1>}, {transform_indices = @transform_1, window_bounds = array<i64: 2, 1024>}, {transform_indices = @transform_2, window_bounds = array<i64: 2, 1024>}]} {
    %c0 = arith.constant 0 : index
    %c0_0 = arith.constant 0 : index
    %0 = vector.load %arg3[%c0, %c0_0] : memref<2x1024xf32, #tpu.memory_space<vmem>>, vector<2x1024xf32>
    %c0_1 = arith.constant 0 : index
    %c0_2 = arith.constant 0 : index
    %1 = vector.load %arg2[%c0_1, %c0_2] : memref<2x1xf32, #tpu.memory_space<vmem>>, vector<2x1xf32>
    %2 = vector.broadcast %1 : vector<2x1xf32> to vector<2x1024xf32>
    %3 = arith.mulf %0, %2 : vector<2x1024xf32>
    %c0_3 = arith.constant 0 : index
    %c0_4 = arith.constant 0 : index
    %4 = vector.load %arg4[%c0_3, %c0_4] : memref<2x1024xf32, #tpu.memory_space<vmem>>, vector<2x1024xf32>
    tpu.vector_store %arg4[%c0_3, %c0_4], %3 {strides = array<i32>} : memref<2x1024xf32, #tpu.memory_space<vmem>>, vector<2x1024xf32>,
    return
  }
  func.func @transform_0(%arg0: i32, %arg1: i32) -> (i32, i32) {
    %c0_i32 = arith.constant 0 : i32
    %c0_i32_0 = arith.constant 0 : i32
    return %arg0, %c0_i32 : i32, i32
  }
  func.func @transform_1(%arg0: i32, %arg1: i32) -> (i32, i32) {
    %c0_i32 = arith.constant 0 : i32
    return %arg0, %arg1 : i32, i32
  }
  func.func @transform_2(%arg0: i32, %arg1: i32) -> (i32, i32) {
    %c0_i32 = arith.constant 0 : i32
    return %arg0, %arg1 : i32, i32
  }
}

</mosaic_0001>

<bundles_post_ra>
// kernel: drop_path.1
= control target key start
LH: loop header
LB: loop body
LE: loop exit
PB: predicated region body
PF: predicated region fallthrough
CT: control target
= control target key end

     0   :  { %v34_v0 = vmov 0   ;;  %v35_v2 = vmov 269488144   ;;  %s66_s0 = inlined_call_operand.vmem [shape: f32[2,1], index: 0, kind: input, shape index: {}]   ;;  %s67_s1 = inlined_call_operand.vmem [shape: f32[2,1024], index: 1, kind: input, shape index: {}]   ;;  %s68_s2 = inlined_call_operand.vmem [shape: f32[2,1024], index: 2, kind: output, shape index: {}]  }
   0x1   :  { %33 = vset.pattern.permute.xlu0 %v34_v0  ;;  %v13_v1 = vld [vmem:[%s66_s0] sm:$0x3]  ;;  %v19_v3 = vunpack.c.l.s4 %v35_v2  ;;  %v12_v6 = vld [vmem:[%s67_s1 + $0x8] sm:$0xff] }
   0x2   :  { %16 = vperm.xlu0 %33, %v13_v1   ;;  %v11_v5 = vld [vmem:[%s67_s1] sm:$0xff] }
   0x3   :  { %v20_v4 = vunpack.c.0.s8 %v19_v3 }
  0x74   :  { %v17_v7 = vpop.permute.xlu0 %16 }
  0x75   :  { %v21_v8 = vperm.slane %v17_v7, %v20_v4 }
  0x77   :  { %v23_v9 = vmul.f32 %v21_v8, %v11_v5  ;;  %v24_v10 = vmul.f32 %v21_v8, %v12_v6 }
  0x79   :  { %25 = vst [vmem:[%s68_s2] sm:$0xff] %v23_v9 }
  0x7a   :  { %26 = vst [vmem:[%s68_s2 + $0x8] sm:$0xff] %v24_v10 }

</bundles_post_ra>
